<compile_context>
chip_gen: v7x
topology: tpu7x:2x2x1
jax: 0.10.0
libtpu: 0.0.40
codegen_flags: <defaults>
</compile_context>

<pallas_src>
import functools

import jax
import jax.numpy as jnp
from jax import lax
from jax.experimental import pallas as pl
from jax.experimental.pallas import tpu as pltpu


def _dice_partial_kernel(logits_ref, targets_ref, out_ref, *,
                         num_classes, s_total, s_tile, tiles_per_chunk,
                         needs_mask, first_masked_block):
    """One (batch b, chunk p, spatial tile t) grid step.

    logits_ref : (C, S_TILE, 128) float VMEM tile (native dtype, cast here)
    targets_ref: (1, S_TILE, 128) int32 VMEM tile (class indices)
    out_ref    : (2, C, 128) float32 lane-dense partials, VMEM-resident across
                 the spatial ("arbitrary") grid axis:
                   out[0] = sum probs * onehot     (intersection)
                   out[1] = sum (probs + onehot)   (denominator)
    """
    p = pl.program_id(1)
    t = pl.program_id(2)
    g = p * tiles_per_chunk + t                      # global spatial block index

    @pl.when(t == 0)
    def _():
        out_ref[...] = jnp.zeros_like(out_ref)

    def probs_from_logits():
        x = logits_ref[...].astype(jnp.float32)
        # sigmoid as a single EUP transcendental (tanh), not exp + reciprocal.
        return 0.5 * jnp.tanh(0.5 * x) + 0.5

    def accumulate(probs, targets):
        cls_ids = lax.broadcasted_iota(jnp.int32, probs.shape, 0)   # class ids
        onehot = (targets == cls_ids).astype(jnp.float32)           # (C, S_TILE, 128)
        out_ref[0, :, :] += jnp.sum(probs * onehot, axis=1)         # (C, 128)
        out_ref[1, :, :] += jnp.sum(probs + onehot, axis=1)         # (C, 128)

    if not needs_mask:
        accumulate(probs_from_logits(), targets_ref[...])
    else:
        @pl.when(g < first_masked_block)
        def _():   # steady state: no iota / select work at all
            accumulate(probs_from_logits(), targets_ref[...])

        @pl.when(g >= first_masked_block)
        def _():   # ragged / out-of-range tail: mask invalid rows only here
            limit = s_total - g * s_tile             # valid rows (may be <= 0)
            row = lax.broadcasted_iota(jnp.int32, (1, s_tile, 128), 1)
            valid = row < limit
            probs = jnp.where(valid, probs_from_logits(), 0.0)
            tgts = jnp.where(valid, targets_ref[...], num_classes)   # no class match
            accumulate(probs, tgts)


def multiclass_soft_dice_loss(logits, targets, smooth=1.0, tile_rows=None):
    """logits: (B, C, H, W) float; targets: (B, H, W) int class indices in [0, C)."""
    B, C, H, W = logits.shape
    HW = H * W

    logits_flat = logits.reshape(B, C, HW)
    targets_flat = targets.reshape(B, 1, HW).astype(jnp.int32)

    rem = HW % 128
    if rem:
        # Only taken when H*W is not a multiple of 128: pad with neutral values
        # (sigmoid(pad_logit) == 0 exactly, pad target matches no class) so the
        # padded columns contribute exactly zero to every partial sum.
        pad = 128 - rem
        logits_flat = jnp.pad(logits_flat, ((0, 0), (0, 0), (0, pad)),
                              constant_values=-1e30)
        targets_flat = jnp.pad(targets_flat, ((0, 0), (0, 0), (0, pad)),
                               constant_values=C)
        HW += pad

    S = HW // 128                                    # spatial rows of 128 lanes
    logits_r = logits_flat.reshape(B, C, S, 128)     # contiguous (free) reshape
    targets_r = targets_flat.reshape(B, 1, S, 128)

    # ---- spatial tile (rows of 128 columns): exact VMEM footprint model ----
    # Per row-of-128: double-buffered inputs (logits + int32 targets) plus ~4
    # f32 (C, ., 128) elementwise temporaries (probs / onehot / products).
    # No sublane padding exists in this layout, so the model is exact.
    if tile_rows is None:
        itemsize = logits.dtype.itemsize
        bytes_per_row = 2 * 128 * (C * itemsize + 4) + 4 * 128 * C * 4
        budget = 12 * 1024 * 1024                    # working-set budget
        tile_rows = max(8, budget // bytes_per_row)
        tile_rows = min(tile_rows, 2048)
    if tile_rows >= S:
        tile_rows = S                                # full extent (any size legal)
    else:
        tile_rows = max(8, (tile_rows // 8) * 8)     # sublane-aligned tile
    s_blocks = pl.cdiv(S, tile_rows)

    # ---- parallel spatial chunks: keep both v7x TensorCores busy for odd B ----
    n_par = 2 if (B % 2 == 1 and s_blocks >= 2) else 1
    tiles_per_chunk = pl.cdiv(s_blocks, n_par)

    needs_mask = (S % tile_rows != 0) or (n_par * tiles_per_chunk != s_blocks)
    first_masked_block = s_blocks - 1 if (S % tile_rows != 0) else s_blocks

    # Generation-aware VMEM limit (v7x: 64 MiB per TC; v5e/v6e: 128 MiB).
    try:
        vmem_cap = pltpu.get_tpu_info().vmem_capacity_bytes
    except Exception:
        vmem_cap = 64 * 1024 * 1024
    vmem_limit = int(min(32 * 1024 * 1024, max(16 * 1024 * 1024, vmem_cap // 3)))

    kernel = functools.partial(
        _dice_partial_kernel,
        num_classes=C, s_total=S, s_tile=tile_rows,
        tiles_per_chunk=tiles_per_chunk,
        needs_mask=needs_mask, first_masked_block=first_masked_block)

    def spatial_block(p, t):
        # Clamp so the (at most n_par-1) fully out-of-range trailing steps still
        # read a valid block; their contribution is masked to zero in-kernel.
        return jnp.minimum(p * tiles_per_chunk + t, s_blocks - 1)

    partials = pl.pallas_call(
        kernel,
        out_shape=jax.ShapeDtypeStruct((B, n_par, 2, C, 128), jnp.float32),
        grid=(B, n_par, tiles_per_chunk),
        in_specs=[
            pl.BlockSpec((None, C, tile_rows, 128),
                         lambda b, p, t: (b, 0, spatial_block(p, t), 0)),
            pl.BlockSpec((None, 1, tile_rows, 128),
                         lambda b, p, t: (b, 0, spatial_block(p, t), 0)),
        ],
        out_specs=pl.BlockSpec((None, None, 2, C, 128),
                               lambda b, p, t: (b, p, 0, 0, 0)),
        compiler_params=pltpu.CompilerParams(
            dimension_semantics=("parallel", "parallel", "arbitrary"),
            vmem_limit_bytes=vmem_limit,
        ),
    )(logits_r, targets_r)

    # Tiny epilogue in plain JAX: fold partials, per-class dice, mean.
    inter = jnp.sum(partials[:, :, 0, :, :], axis=(0, 1, 3))   # (C,)
    denom = jnp.sum(partials[:, :, 1, :, :], axis=(0, 1, 3))   # (C,)
    dice_losses = 1.0 - (2.0 * inter + smooth) / (denom + smooth)
    return jnp.mean(dice_losses)


if __name__ == "__main__":
    key = jax.random.PRNGKey(0)
    k1, k2 = jax.random.split(key)

    B, C, H, W = 2, 4, 16, 16
    logits = jax.random.normal(k1, (B, C, H, W), dtype=jnp.float32)
    targets = jax.random.randint(k2, (B, H, W), 0, C, dtype=jnp.int32)

    loss = multiclass_soft_dice_loss(logits, targets, smooth=1.0)
    loss = jax.block_until_ready(loss)

    # Pure-JAX reference of the PyTorch forward for validation.
    probs = jax.nn.sigmoid(logits)
    onehot = jax.nn.one_hot(targets, C, axis=1, dtype=jnp.float32)
    inter = jnp.sum(probs * onehot, axis=(0, 2, 3))
    psum = jnp.sum(probs, axis=(0, 2, 3))
    tsum = jnp.sum(onehot, axis=(0, 2, 3))
    ref = jnp.mean(1.0 - (2.0 * inter + 1.0) / (psum + tsum + 1.0))

    assert jnp.allclose(loss, ref, rtol=1e-5, atol=1e-5), (float(loss), float(ref))
    print("KERNEL_OK")
</pallas_src>

<mosaic_0001>
module attributes {stable_mosaic.version = 11 : i64} {
  func.func @_dice_partial_kernel(%arg0: i32, %arg1: i32, %arg2: i32, %arg3: memref<1x4x2x128xf32, #tpu.memory_space<vmem>>, %arg4: memref<1x1x2x128xi32, #tpu.memory_space<vmem>>, %arg5: memref<1x1x2x4x128xf32, #tpu.memory_space<vmem>>) attributes {dimension_semantics = [#tpu.dimension_semantics<parallel>, #tpu.dimension_semantics<parallel>, #tpu.dimension_semantics<arbitrary>], iteration_bounds = array<i64: 2, 1, 1>, scalar_prefetch = 0 : i64, scratch_operands = 0 : i64, tpu.core_type = #tpu.core_type<tc>, window_params = [{transform_indices = @transform_0, window_bounds = array<i64: 1, 4, 2, 128>}, {transform_indices = @transform_1, window_bounds = array<i64: 1, 1, 2, 128>}, {transform_indices = @transform_2, window_bounds = array<i64: 1, 1, 2, 4, 128>}]} {
    %c0_i32 = arith.constant 0 : i32
    %0 = arith.cmpi eq, %arg2, %c0_i32 : i32
    %1 = arith.extui %0 : i1 to i32
    %c0_i32_0 = arith.constant 0 : i32
    %2 = arith.cmpi ne, %1, %c0_i32_0 : i32
    scf.if %2 {
      %cst_31 = arith.constant 0.000000e+00 : f32
      %35 = vector.broadcast %cst_31 : f32 to vector<2x4x128xf32>
      %c0_32 = arith.constant 0 : index
      %c0_33 = arith.constant 0 : index
      %c0_34 = arith.constant 0 : index
      %c0_35 = arith.constant 0 : index
      %c0_36 = arith.constant 0 : index
      %36 = vector.load %arg5[%c0_32, %c0_33, %c0_34, %c0_35, %c0_36] : memref<1x1x2x4x128xf32, #tpu.memory_space<vmem>>, vector<1x1x2x4x128xf32>
      %37 = vector.shape_cast %36 : vector<1x1x2x4x128xf32> to vector<2x4x128xf32>
      %38 = vector.shape_cast %35 : vector<2x4x128xf32> to vector<1x1x2x4x128xf32>
      tpu.vector_store %arg5[%c0_32, %c0_33, %c0_34, %c0_35, %c0_36], %38 {strides = array<i32>} : memref<1x1x2x4x128xf32, #tpu.memory_space<vmem>>, vector<1x1x2x4x128xf32>,
    } else {
    }
    %c0 = arith.constant 0 : index
    %c0_1 = arith.constant 0 : index
    %c0_2 = arith.constant 0 : index
    %c0_3 = arith.constant 0 : index
    %3 = vector.load %arg3[%c0, %c0_1, %c0_2, %c0_3] : memref<1x4x2x128xf32, #tpu.memory_space<vmem>>, vector<1x4x2x128xf32>
    %4 = vector.shape_cast %3 : vector<1x4x2x128xf32> to vector<4x2x128xf32>
    %cst = arith.constant 5.000000e-01 : f32
    %5 = vector.broadcast %cst : f32 to vector<4x2x128xf32>
    %6 = arith.mulf %5, %4 : vector<4x2x128xf32>
    %7 = math.tanh %6 : vector<4x2x128xf32>
    %cst_4 = arith.constant 5.000000e-01 : f32
    %8 = vector.broadcast %cst_4 : f32 to vector<4x2x128xf32>
    %9 = arith.mulf %8, %7 : vector<4x2x128xf32>
    %cst_5 = arith.constant 5.000000e-01 : f32
    %10 = vector.broadcast %cst_5 : f32 to vector<4x2x128xf32>
    %11 = arith.addf %9, %10 : vector<4x2x128xf32>
    %c0_6 = arith.constant 0 : index
    %c0_7 = arith.constant 0 : index
    %c0_8 = arith.constant 0 : index
    %c0_9 = arith.constant 0 : index
    %12 = vector.load %arg4[%c0_6, %c0_7, %c0_8, %c0_9] : memref<1x1x2x128xi32, #tpu.memory_space<vmem>>, vector<1x1x2x128xi32>
    %13 = vector.shape_cast %12 : vector<1x1x2x128xi32> to vector<1x2x128xi32>
    %14 = tpu.iota {dimensions = array<i32: 0>} : vector<4x2x128xi32>
    %15 = vector.broadcast %13 : vector<1x2x128xi32> to vector<4x2x128xi32>
    %16 = arith.cmpi eq, %15, %14 : vector<4x2x128xi32>
    %17 = arith.extui %16 : vector<4x2x128xi1> to vector<4x2x128xi32>
    %18 = arith.sitofp %17 : vector<4x2x128xi32> to vector<4x2x128xf32>
    %c0_10 = arith.constant 0 : index
    %c0_11 = arith.constant 0 : index
    %c0_12 = arith.constant 0 : index
    %c0_13 = arith.constant 0 : index
    %c0_14 = arith.constant 0 : index
    %19 = vector.load %arg5[%c0_10, %c0_11, %c0_12, %c0_13, %c0_14] : memref<1x1x2x4x128xf32, #tpu.memory_space<vmem>>, vector<1x1x1x4x128xf32>
    %20 = vector.shape_cast %19 : vector<1x1x1x4x128xf32> to vector<4x128xf32>
    %21 = arith.mulf %11, %18 : vector<4x2x128xf32>
    %cst_15 = arith.constant dense<0.000000e+00> : vector<4x128xf32>
    %22 = vector.multi_reduction <add>, %21, %cst_15 [1] : vector<4x2x128xf32> to vector<4x128xf32>
    %23 = arith.addf %20, %22 : vector<4x128xf32>
    %c0_16 = arith.constant 0 : index
    %c0_17 = arith.constant 0 : index
    %c0_18 = arith.constant 0 : index
    %c0_19 = arith.constant 0 : index
    %c0_20 = arith.constant 0 : index
    %24 = vector.load %arg5[%c0_16, %c0_17, %c0_18, %c0_19, %c0_20] : memref<1x1x2x4x128xf32, #tpu.memory_space<vmem>>, vector<1x1x1x4x128xf32>
    %25 = vector.shape_cast %24 : vector<1x1x1x4x128xf32> to vector<4x128xf32>
    %26 = vector.shape_cast %23 : vector<4x128xf32> to vector<1x1x1x4x128xf32>
    tpu.vector_store %arg5[%c0_16, %c0_17, %c0_18, %c0_19, %c0_20], %26 {strides = array<i32>} : memref<1x1x2x4x128xf32, #tpu.memory_space<vmem>>, vector<1x1x1x4x128xf32>,
    %c0_21 = arith.constant 0 : index
    %c0_22 = arith.constant 0 : index
    %c1 = arith.constant 1 : index
    %c0_23 = arith.constant 0 : index
    %c0_24 = arith.constant 0 : index
    %27 = vector.load %arg5[%c0_21, %c0_22, %c1, %c0_23, %c0_24] : memref<1x1x2x4x128xf32, #tpu.memory_space<vmem>>, vector<1x1x1x4x128xf32>
    %28 = vector.shape_cast %27 : vector<1x1x1x4x128xf32> to vector<4x128xf32>
    %29 = arith.addf %11, %18 : vector<4x2x128xf32>
    %cst_25 = arith.constant dense<0.000000e+00> : vector<4x128xf32>
    %30 = vector.multi_reduction <add>, %29, %cst_25 [1] : vector<4x2x128xf32> to vector<4x128xf32>
    %31 = arith.addf %28, %30 : vector<4x128xf32>
    %c0_26 = arith.constant 0 : index
    %c0_27 = arith.constant 0 : index
    %c1_28 = arith.constant 1 : index
    %c0_29 = arith.constant 0 : index
    %c0_30 = arith.constant 0 : index
    %32 = vector.load %arg5[%c0_26, %c0_27, %c1_28, %c0_29, %c0_30] : memref<1x1x2x4x128xf32, #tpu.memory_space<vmem>>, vector<1x1x1x4x128xf32>
    %33 = vector.shape_cast %32 : vector<1x1x1x4x128xf32> to vector<4x128xf32>
    %34 = vector.shape_cast %31 : vector<4x128xf32> to vector<1x1x1x4x128xf32>
    tpu.vector_store %arg5[%c0_26, %c0_27, %c1_28, %c0_29, %c0_30], %34 {strides = array<i32>} : memref<1x1x2x4x128xf32, #tpu.memory_space<vmem>>, vector<1x1x1x4x128xf32>,
    return
  }
  func.func @transform_0(%arg0: i32, %arg1: i32, %arg2: i32) -> (i32, i32, i32, i32) {
    %c1_i32 = arith.constant 1 : i32
    %0 = arith.muli %arg1, %c1_i32 : i32
    %1 = arith.addi %0, %arg2 : i32
    %c0_i32 = arith.constant 0 : i32
    %2 = arith.minsi %1, %c0_i32 : i32
    %c0_i32_0 = arith.constant 0 : i32
    %c0_i32_1 = arith.constant 0 : i32
    %c0_i32_2 = arith.constant 0 : i32
    return %arg0, %c0_i32_0, %2, %c0_i32_1 : i32, i32, i32, i32
  }
  func.func @transform_1(%arg0: i32, %arg1: i32, %arg2: i32) -> (i32, i32, i32, i32) {
    %c1_i32 = arith.constant 1 : i32
    %0 = arith.muli %arg1, %c1_i32 : i32
    %1 = arith.addi %0, %arg2 : i32
    %c0_i32 = arith.constant 0 : i32
    %2 = arith.minsi %1, %c0_i32 : i32
    %c0_i32_0 = arith.constant 0 : i32
    %c0_i32_1 = arith.constant 0 : i32
    %c0_i32_2 = arith.constant 0 : i32
    return %arg0, %c0_i32_0, %2, %c0_i32_1 : i32, i32, i32, i32
  }
  func.func @transform_2(%arg0: i32, %arg1: i32, %arg2: i32) -> (i32, i32, i32, i32, i32) {
    %c0_i32 = arith.constant 0 : i32
    %c0_i32_0 = arith.constant 0 : i32
    %c0_i32_1 = arith.constant 0 : i32
    %c0_i32_2 = arith.constant 0 : i32
    return %arg0, %arg1, %c0_i32, %c0_i32_0, %c0_i32_1 : i32, i32, i32, i32, i32
  }
}

</mosaic_0001>

<bundles_post_ra>
// kernel: tpu_custom_call.1
= control target key start
LH: loop header
LB: loop body
LE: loop exit
PB: predicated region body
PF: predicated region fallthrough
CT: control target
= control target key end

     0   :  { %7 = vsyncpa [#allocation3], 0  ;;  %s1026_s0 = inlined_call_operand.hbm [shape: f32[2,4,2,128], index: 0, kind: input, shape index: {}]   ;;  %s1027_s1 = inlined_call_operand.hbm [shape: s32[2,1,2,128], index: 1, kind: input, shape index: {}]   ;;  %s1028_s2 = inlined_call_operand.hbm [shape: f32[2,1,2,4,128], index: 2, kind: output, shape index: {}]  }
   0x1   :  { %9 = vsyncpa [#allocation3 + $0x1], 0 }
   0x2   :  { %10 = vsyncpa [#allocation6], 0 }
   0x3   :  { %12 = vsyncpa [#allocation6 + $0x1], 0 }
   0x4   :  { %13 = vsyncpa [#allocation4], 0 }
   0x5   :  { %15 = vsyncpa [#allocation4 + $0x1], 0  ;;  %s786_s9 = smov 0   ;;  %s788_s10 = smov 0  }
   0x6   :  { %s790_s11 = smov 0   ;;  %s792_s12 = smov 0  }
   0x7   :  { %s794_s13 = smov 0   ;;  %s796_s14 = smov 0  }
   0x8 LB: > { %s509_s15 = sadd.s32 4294967295, %s761_s14   ;;  %s510_s16 = sadd.s32 4294967294, %s761_s14   ;;  %s761_s14 = sphi %s796_s14, %s21_s14   ;;  %s757_s13 = sphi %s794_s13, %s1047_s13   ;;  %s753_s12 = sphi %s792_s12, %s1046_s12   ;;  %s749_s11 = sphi %s790_s11, %s1045_s11   ;;  %s745_s10 = sphi %s788_s10, %s1044_s10   ;;  %s741_s9 = sphi %s786_s9, %s1043_s9  }
   0x9   : > { %s40_s17 = sadd.s32 1, %s757_s13  ;;  %s55_s18 = sadd.s32 1, %s749_s11 }
   0xa   : > { %p42_p0 = scmp.ge.s32.totalorder %s40_s17, 2  ;;  %p62_p1 = scmp.ne.s32.totalorder %s749_s11, %s745_s10 }
   0xb   : > { %p63_p2 = scmp.eq.s32.totalorder %s761_s14, 0  ;;  %p68_p3 = scmp.ne.s32.totalorder %s745_s10, %s741_s9 }
   0xc   : > { %s1049_s17 = smov (%p42_p0, %s40_s17), 0  ;;  %p69_p5 = scmp.eq.s32.totalorder %s509_s15, 0 }
   0xd   : > { %p827_p4 = por %p63_p2, %p62_p1  ;;  %s50_s20 = ssub.s32 %s757_s13, %s1049_s17 }
   0xe   : > { %p128_p6 = scmp.eq.s32.totalorder %s509_s15, 1  ;;  %p53_p7 = scmp.eq.s32.totalorder %s50_s20, 0 }
   0xf   : > { %p833_p8 = por %p69_p5, %p68_p3  ;;  %p134_p10 = scmp.eq.s32.totalorder %s510_s16, 1 }
  0x10   : > { %p837_p9 = por %p128_p6, %p62_p1  ;;  %p552_p13 = scmp.lt.s32.totalorder %s761_s14, 2 }
  0x11   : > { %s1032_s21 = scalar_select %p833_p8, 1, 0 }
  0x12   : > { %s1033_s22 = scalar_select %p837_p9, 1, 0 }
  0x13   : > { %s842_s23 = scalar_select %p53_p7, %s749_s11, %s55_s18  }
  0x14   : > { %p844_p11 = por %p134_p10, %p68_p3  ;;  %s851_s25 = sand.u32 1, %s749_s11  }
  0x15   : > { %s513_s26 = sshll.u32 %s851_s25, 3  ;;  %s533_s27 = sshll.u32 %s757_s13, 7 }
  0x16   : > { %s1034_s24 = scalar_select %p844_p11, 1, 0 }
  0x17   : > { %s858_s30 = scalar_lea.hbm %s1026_s0, %s533_s27  ;;  %s158_s3 = scalar_lea.vmem [#allocation2], %s513_s26 }
  0x18   : > { %s169_s4 = sshll.u32 %s158_s3, 4  ;;  %p864_p0 = pnand %p552_p13, %p827_p4  ;;  %s860_s4 = int_to_ptr.vmem [resolvable:$true] %s169_s4 }
  0x19   : > { %s155_s6 = scalar_lea.sflag [#allocation3], %s851_s25  ;;  %s615_s7 = scalar_lea.hbm %s858_s30, 128 }
  0x1a   : > { %p616_p2 = scmp.ne.s32.totalorder %s858_s30, %s615_s7  ;;  %p617_p3 = pneg %p864_p0 }
  0x1b   : > { %s620_s16 = scalar_lea.hbm %s1026_s0, 256  ;;  %p621_p4 = scmp.lt.u32.totalorder %s858_s30, %s1026_s0 }
  0x1c   : > { %p618_p5 = pnand %p617_p3, %p616_p2  ;;  %p622_p7 = scmp.lt.u32.totalorder %s620_s16, %s615_s7 }
  0x1d   : > { %p624_p13 = scmp.lt.u32.totalorder %s615_s7, %s858_s30 }
  0x1e   : > { %p619_p6 = pneg %p618_p5  ;;  %p623_p10 = por %p622_p7, %p621_p4 }
  0x20   : > { %p625_p12 = por %p624_p13, %p623_p10 }
  0x22   : > { %p626_p1 = pnand %p625_p12, %p619_p6 }
  0x24   : > { %629 = shalt.err (!%p626_p1)
}
  0x25   : > { %s630_s20 = scalar_lea.vmem %s860_s4, 128  ;;  %s763_s26 = smov [#allocation2]  }
  0x26   : > { %p631_p2 = scmp.ne.s32.totalorder %s860_s4, %s630_s20  ;;  %s635_s27 = sshll.u32 %s763_s26, 4  ;;  %s636_s27 = int_to_ptr.vmem [resolvable:$false] %s635_s27 }
  0x27   : > { %s637_s28 = scalar_lea.vmem %s636_s27, 256  ;;  %p638_p9 = scmp.lt.s32.totalorder %s860_s4, %s636_s27 }
  0x28   : > { %p633_p5 = pnand %p631_p2, %p617_p3  ;;  %p639_p4 = scmp.lt.s32.totalorder %s637_s28, %s630_s20 }
  0x2a   : > { %p634_p11 = pneg %p633_p5  ;;  %p640_p7 = por %p639_p4, %p638_p9 }
  0x2c   : > { %p641_p10 = pnand %p640_p7, %p634_p11 }
  0x2e   : > { %644 = shalt.err (!%p641_p10)
}
  0x2f   : > { %s764_s29 = smov 32   ;;  %s765_s3 = smov 2  }
  0x30   : > { %544 = dma.hbm_to_vmem [thread:$0]  (!%p864_p0), %s858_s30, 128, %s860_s4, %s155_s6, %s764_s29, %s764_s29, %s765_s3  }
  0x31   : > { %p199_p12 = scmp.lt.s32.totalorder %s761_s14, 3  ;;  %s516_s7 = sshll.u32 %s851_s25, 1 }
  0x32   : > { %s517_s8 = sshll.u32 %s757_s13, 5  ;;  %p1036_p9 = scmp.ge.s32.totalorder %s761_s14, 1 }
  0x33   : > { %s909_s19 = scalar_lea.hbm %s1027_s1, %s517_s8  ;;  %s183_s20 = scalar_lea.vmem [#allocation5], %s516_s7 }
  0x34   : > { %p902_p11 = pnand %p1036_p9, %p199_p12  ;;  %s194_s26 = sshll.u32 %s183_s20, 4  ;;  %s195_s26 = int_to_ptr.vmem [resolvable:$true] %s194_s26 }
  0x35   : > { %s180_s30 = scalar_lea.sflag [#allocation6], %s851_s25  ;;  %s645_s4 = scalar_lea.hbm %s909_s19, 32 }
  0x36   : > { %s1037_s15 = scalar_select %p902_p11, 1, 0 }
  0x37   : > { %p646_p1 = scmp.ne.s32.totalorder %s909_s19, %s645_s4  ;;  %s650_s28 = scalar_lea.hbm %s1027_s1, 64 }
  0x38   : > { %p651_p2 = scmp.lt.u32.totalorder %s909_s19, %s1027_s1  ;;  %p652_p5 = scmp.lt.u32.totalorder %s650_s28, %s645_s4 }
  0x39   : > { %p648_p6 = pnand %p646_p1, %p617_p3  ;;  %p654_p7 = scmp.lt.u32.totalorder %s645_s4, %s909_s19 }
  0x3a   : > { %p653_p4 = por %p652_p5, %p651_p2 }
  0x3b   : > { %p649_p13 = pneg %p648_p6 }
  0x3c   : > { %p655_p10 = por %p654_p7, %p653_p4 }
  0x3e   : > { %p656_p12 = pnand %p655_p10, %p649_p13 }
  0x40   : > { %659 = shalt.err (!%p656_p12)
}
  0x41   : > { %s660_s25 = scalar_lea.vmem %s195_s26, 32  ;;  %s766_s7 = smov [#allocation5]  }
  0x42   : > { %p661_p9 = scmp.ne.s32.totalorder %s195_s26, %s660_s25  ;;  %s665_s8 = sshll.u32 %s766_s7, 4  ;;  %s666_s8 = int_to_ptr.vmem [resolvable:$false] %s665_s8 }
  0x43   : > { %s667_s16 = scalar_lea.vmem %s666_s8, 64  ;;  %p668_p8 = scmp.lt.s32.totalorder %s195_s26, %s666_s8 }
  0x44   : > { %p663_p1 = pnand %p661_p9, %p617_p3  ;;  %p669_p11 = scmp.lt.s32.totalorder %s667_s16, %s660_s25 }
  0x46   : > { %p664_p6 = pneg %p663_p1  ;;  %p670_p2 = por %p669_p11, %p668_p8 }
  0x48   : > { %p671_p5 = pnand %p670_p2, %p664_p6 }
  0x4a   : > { %674 = shalt.err (!%p671_p5)
}
  0x4b   : > { %547 = dma.hbm_to_vmem [thread:$0]  (!%p864_p0), %s909_s19, 32, %s195_s26, %s180_s30  }
  0x4c   : > { %p1038_p13 = scmp.ne.s32.totalorder %s1037_s15, 0 }
  0x4d   : > { %s934_s18 = sand.u32 (!%p1038_p13), 1, %s745_s10   ;;  %p1039_p3 = scmp.ne.s32.totalorder (!%p1038_p13), %s1032_s21, 0 }
  0x4e   : > { %203 = sbr.rel (%p1038_p13) target bundleno = 147 (0x93), region = 28  ;;  %s519_s20 = sshll.u32 (!%p1038_p13), %s934_s18, 3 }
  0x4f   : > { %s206_s4 = scalar_lea.sflag (!%p1038_p13), [#allocation3], %s934_s18  ;;  %s209_s6 = scalar_lea.vmem (!%p1038_p13), [#allocation2], %s519_s20 }
  0x55   : > { %728 = dma.done.wait (%p1039_p3), %s206_s4, 128  }
  0x56   : > { %730 = vsyncadd (%p1039_p3), %s206_s4, 4294967168  ;;  %s520_s5 = sshll.u32 %s934_s18, 1  ;;  %s215_s15 = scalar_lea.sflag [#allocation6], %s934_s18 }
  0x57   : > { %s218_s19 = scalar_lea.vmem [#allocation5], %s520_s5 }
  0x58   : > { %732 = dma.done.wait (%p1039_p3), %s215_s15, 32  }
  0x59   : > { %734 = vsyncadd (%p1039_p3), %s215_s15, 4294967264  ;;  %s948_s26 = scalar_lea.vmem [#allocation7], %s519_s20  ;;  %v767_v0 = vmov 0.0   ;;  %v256_v1 = vld [vmem:[%s209_s6] sm:$0x3]  ;;  %vm294_vm4 = vcmask 1041408  }
  0x5a   : > { %254 = vst [vmem:[%s948_s26] sm:$0xf] %v767_v0  ;;  %255 = vst [vmem:[%s948_s26 + $0x4] sm:$0xf] %v767_v0  ;;  %v257_v2 = vld [vmem:[%s209_s6 + $0x2] sm:$0x3]  ;;  %v260_v5 = vmul.f32 0.5, %v256_v1 }
  0x5b   : > { %v258_v3 = vld [vmem:[%s209_s6 + $0x4] sm:$0x3]  ;;  %v259_v4 = vld [vmem:[%s209_s6 + $0x6] sm:$0x3]  ;;  %v261_v6 = vmul.f32 0.5, %v257_v2  ;;  %vm327_vm5 = vcmask 1041409  }
  0x5c   : > { %v262_v7 = vmul.f32 0.5, %v258_v3  ;;  %v263_v8 = vmul.f32 0.5, %v259_v4  ;;  %607 = vtanh.f32 %v260_v5  ;;  %v276_v9 = vld [vmem:[%s218_s19] sm:$0x3]  ;;  %vm329_vm6 = vcmask 1042434   ;;  %s534_s21 = sshll.u32 %s753_s12, 7 }
  0x5d   : > { %609 = vtanh.f32 %v261_v6  ;;  %vm277_vm0 = vcmp.eq.s32.totalorder %v276_v9, 0  ;;  %vm278_vm1 = vcmp.eq.s32.totalorder %v276_v9, 1  ;;  %vm279_vm2 = vcmp.eq.s32.totalorder %v276_v9, 2  ;;  %s396_s30 = sshll.u32 %s948_s26, 4  ;;  %s974_s29 = scalar_lea.hbm %s1028_s2, %s534_s21  ;;  %s976_s30 = int_to_ptr.vmem [resolvable:$true] %s396_s30 }
  0x5e   : > { %611 = vtanh.f32 %v262_v7  ;;  %vm280_vm3 = vcmp.eq.s32.totalorder %v276_v9, 3  ;;  %v522_v15 = vsel %vm277_vm0, 1.0, %v767_v0  ;;  %v523_v19 = vsel %vm278_vm1, 1.0, %v767_v0  ;;  %s381_s3 = scalar_lea.sflag [#allocation4], %s934_s18  ;;  %s675_s12 = scalar_lea.vmem %s976_s30, 128 }
  0x5f   : > { %613 = vtanh.f32 %v263_v8  ;;  %v524_v22 = vsel %vm279_vm2, 1.0, %v767_v0  ;;  %v525_v24 = vsel %vm280_vm3, 1.0, %v767_v0  ;;  %vm331_vm7 = vcmask 1043459   ;;  %p676_p8 = scmp.ne.s32.totalorder %s976_s30, %s675_s12  ;;  %p1040_p0 = scmp.ne.s32.totalorder %s1033_s22, 0 }
  0x60   : > { %s768_s25 = smov [#allocation7]  }
  0x61   : > { %p677_p11 = pnand %p676_p8, %p1040_p0  ;;  %s679_s7 = sshll.u32 %s768_s25, 4  ;;  %s680_s7 = int_to_ptr.vmem [resolvable:$false] %s679_s7 }
  0x62   : > { %s681_s8 = scalar_lea.vmem %s680_s7, 256  ;;  %p682_p7 = scmp.lt.s32.totalorder %s976_s30, %s680_s7 }
  0x63   : > { %p678_p4 = pneg %p677_p11  ;;  %p683_p10 = scmp.lt.s32.totalorder %s681_s8, %s675_s12 }
  0x65   : > { %p684_p12 = por %p683_p10, %p682_p7 }
  0x66   : > { %v608_v10 = vpop.eup %607 }
  0x67   : > { %v610_v11 = vpop.eup %609  ;;  %v268_v12 = vmul.f32 0.5, %v608_v10  ;;  %p685_p9 = pnand %p684_p12, %p678_p4 }
  0x68   : > { %v612_v13 = vpop.eup %611  ;;  %v269_v14 = vmul.f32 0.5, %v610_v11 }
  0x69   : > { %v614_v16 = vpop.eup %613  ;;  %v270_v17 = vmul.f32 0.5, %v612_v13  ;;  %v272_v18 = vadd.f32 0.5, %v268_v12 }
  0x6a   : > { %v271_v20 = vmul.f32 0.5, %v614_v16  ;;  %v273_v21 = vadd.f32 0.5, %v269_v14 }
  0x6b   : > { %v274_v23 = vadd.f32 0.5, %v270_v17  ;;  %v290_v25 = vmul.f32 %v522_v15, %v272_v18  ;;  %v338_v26 = vadd.f32 %v522_v15, %v272_v18 }
  0x6c   : > { %v275_v27 = vadd.f32 0.5, %v271_v20  ;;  %v291_v28 = vmul.f32 %v523_v19, %v273_v21  ;;  %v339_v29 = vadd.f32 %v523_v19, %v273_v21  ;;  %v289_v21 = vld [vmem:[%s948_s26] sm:$0xf] }
  0x6d   : > { %v292_v30 = vmul.f32 %v524_v22, %v274_v23  ;;  %v295_v31 = vsel %vm294_vm4, %v290_v25, 0.0  ;;  %v340_v32 = vadd.f32 %v524_v22, %v274_v23  ;;  %v342_v33 = vsel %vm294_vm4, %v338_v26, 0.0 }
  0x6e   : > { %v293_v34 = vmul.f32 %v525_v24, %v275_v27  ;;  %v296_v35 = vrot.slane %v295_v31, 4  ;;  %v302_v36 = vsel %vm294_vm4, %v291_v28, 0.0  ;;  %v341_v37 = vadd.f32 %v525_v24, %v275_v27 }
  0x6f   : > { %v303_v38 = vrot.slane %v302_v36, 4  ;;  %v343_v39 = vrot.slane %v342_v33, 4  ;;  %v349_v40 = vsel %vm294_vm4, %v339_v29, 0.0  ;;  %v309_v41 = vsel %vm294_vm4, %v292_v30, 0.0 }
  0x70   : > { %v350_v42 = vrot.slane %v349_v40, 4  ;;  %v297_v43 = vadd.f32 %v296_v35, %v295_v31  ;;  %v310_v44 = vrot.slane %v309_v41, 4  ;;  %v316_v45 = vsel %vm294_vm4, %v293_v34, 0.0 }
  0x71   : > { %v304_v46 = vadd.f32 %v303_v38, %v302_v36  ;;  %v317_v47 = vrot.slane %v316_v45, 4  ;;  %v344_v48 = vadd.f32 %v343_v39, %v342_v33  ;;  %v356_v49 = vsel %vm294_vm4, %v340_v32, 0.0  ;;  %v526_v32 = vld [vmem:[%s948_s26 + $0x4] sm:$0xf] }
  0x72   : > { %v298_v50 = vrot.slane %v297_v43, 2  ;;  %v311_v51 = vadd.f32 %v310_v44, %v309_v41  ;;  %v351_v52 = vadd.f32 %v350_v42, %v349_v40  ;;  %v357_v53 = vrot.slane %v356_v49, 4 }
  0x73   : > { %v305_v54 = vrot.slane %v304_v46, 2  ;;  %v318_v55 = vadd.f32 %v317_v47, %v316_v45  ;;  %v345_v56 = vrot.slane %v344_v48, 2  ;;  %v363_v57 = vsel %vm294_vm4, %v341_v37, 0.0 }
  0x74   : > { %v299_v58 = vadd.f32 %v298_v50, %v297_v43  ;;  %v312_v59 = vrot.slane %v311_v51, 2  ;;  %v352_v60 = vrot.slane %v351_v52, 2  ;;  %v358_v61 = vadd.f32 %v357_v53, %v356_v49 }
  0x75   : > { %v306_v62 = vadd.f32 %v305_v54, %v304_v46  ;;  %v319_v63 = vrot.slane %v318_v55, 2  ;;  %v346_v0 = vadd.f32 %v345_v56, %v344_v48  ;;  %v364_v1 = vrot.slane %v363_v57, 4 }
  0x76   : > { %v300_v2 = vrot.slane %v299_v58, 1  ;;  %v313_v3 = vadd.f32 %v312_v59, %v311_v51  ;;  %v353_v4 = vadd.f32 %v352_v60, %v351_v52  ;;  %v359_v5 = vrot.slane %v358_v61, 2 }
  0x77   : > { %v307_v6 = vrot.slane %v306_v62, 1  ;;  %v320_v7 = vadd.f32 %v319_v63, %v318_v55  ;;  %v347_v8 = vrot.slane %v346_v0, 1  ;;  %v365_v9 = vadd.f32 %v364_v1, %v363_v57 }
  0x78   : > { %v301_v10 = vadd.f32 %v300_v2, %v299_v58  ;;  %v314_v11 = vrot.slane %v313_v3, 1  ;;  %v354_v12 = vrot.slane %v353_v4, 1  ;;  %v360_v13 = vadd.f32 %v359_v5, %v358_v61 }
  0x79   : > { %v308_v14 = vadd.f32 %v307_v6, %v306_v62  ;;  %v321_v15 = vrot.slane %v320_v7, 1  ;;  %v348_v16 = vadd.f32 %v347_v8, %v346_v0  ;;  %v366_v17 = vrot.slane %v365_v9, 2 }
  0x7a   : > { %v315_v18 = vadd.f32 %v314_v11, %v313_v3  ;;  %v355_v19 = vadd.f32 %v354_v12, %v353_v4  ;;  %v361_v20 = vrot.slane %v360_v13, 1 }
  0x7b   : > { %v322_v22 = vadd.f32 %v321_v15, %v320_v7  ;;  %v328_v23 = vsel %vm327_vm5, %v308_v14, %v301_v10  ;;  %v367_v24 = vadd.f32 %v366_v17, %v365_v9 }
  0x7c   : > { %v330_v25 = vsel %vm329_vm6, %v315_v18, %v328_v23  ;;  %v362_v26 = vadd.f32 %v361_v20, %v360_v13  ;;  %v374_v27 = vsel %vm327_vm5, %v355_v19, %v348_v16 }
  0x7d   : > { %v332_v28 = vsel %vm331_vm7, %v322_v22, %v330_v25  ;;  %v368_v29 = vrot.slane %v367_v24, 1 }
  0x7e   : > { %v334_v30 = vadd.f32 %v332_v28, %v289_v21  ;;  %v375_v31 = vsel %vm329_vm6, %v362_v26, %v374_v27 }
  0x7f   : > { %v369_v33 = vadd.f32 %v368_v29, %v367_v24 }
  0x80   : > { %335 = vst [vmem:[%s948_s26] sm:$0xf] %v334_v30 }
  0x81   : > { %v376_v34 = vsel %vm331_vm7, %v369_v33, %v375_v31 }
  0x82   : > { %v378_v35 = vadd.f32 %v526_v32, %v376_v34 }
  0x84   : > { %527 = vst [vmem:[%s948_s26 + $0x4] sm:$0xf] %v378_v35 }
  0x85   : > { %688 = shalt.err (!%p685_p9)
}
  0x86   : > { %s689_s16 = scalar_lea.hbm %s974_s29, 128  ;;  %s693_s6 = scalar_lea.hbm %s1028_s2, 256 }
  0x87   : > { %p690_p1 = scmp.ne.s32.totalorder %s974_s29, %s689_s16  ;;  %p694_p5 = scmp.lt.u32.totalorder %s974_s29, %s1028_s2 }
  0x88   : > { %p695_p13 = scmp.lt.u32.totalorder %s693_s6, %s689_s16  ;;  %p697_p8 = scmp.lt.u32.totalorder %s689_s16, %s974_s29 }
  0x89   : > { %p691_p6 = pnand %p690_p1, %p1040_p0 }
  0x8a   : > { %p696_p3 = por %p695_p13, %p694_p5 }
  0x8b   : > { %p692_p2 = pneg %p691_p6 }
  0x8c   : > { %p698_p11 = por %p697_p8, %p696_p3 }
  0x8e   : > { %p699_p4 = pnand %p698_p11, %p692_p2 }
  0x90   : > { %702 = shalt.err (!%p699_p4)
}
  0x91   : > { %s769_s19 = smov 64   ;;  %s770_s26 = smov 4  }
  0x92   : > { %539 = dma.vmem_to_hbm [thread:$0]  (%p1040_p0), %s976_s30, 128, %s974_s29, %s381_s3, %s769_s19, %s769_s19, %s770_s26  }
  0x93 PF: > { %s411_s21 = sand.u32 1, %s741_s9   ;;  %p1041_p7 = scmp.ne.s32.totalorder %s1034_s24, 0 }
  0x94   : > { %p1042_p10 = scmp.ge.s32.totalorder %s761_s14, 2  ;;  %s412_s27 = scalar_lea.sflag [#allocation4], %s411_s21 }
  0x96   : > { %p549_p12 = pnand %p1042_p10, %p1041_p7 }
  0x98   : > { %736 = dma.done.wait (!%p549_p12), %s412_s27, 128  }
  0x99   : > { %738 = vsyncadd (!%p549_p12), %s412_s27, 4294967168  ;;  %s21_s14 = sadd.s32 1, %s761_s14   ;;  %s1043_s9 = smov %s745_s10 }
  0x9a   : > { %p18_p9 = scmp.ge.s32.totalorder %s21_s14, 4   ;;  %s1044_s10 = smov %s749_s11 }
  0x9b   : > { %s1045_s11 = smov %s842_s23  ;;  %s1046_s12 = smov %s757_s13 }
  0x9c   : > { %s1047_s13 = smov %s1049_s17  ;;  %20 = sbr.rel (!%p18_p9) target bundleno = 8 (0x8), region = 91 }
  0xa3   :  { %417 = vsyncpa [#allocation3], 1 }
  0xa4   :  { %419 = vsyncpa [#allocation3 + $0x1], 1 }
  0xa5   :  { %420 = vsyncpa [#allocation6], 1 }
  0xa6   :  { %422 = vsyncpa [#allocation6 + $0x1], 1 }
  0xa7   :  { %423 = vsyncpa [#allocation4], 1 }
  0xa8   :  { %425 = vsyncpa [#allocation4 + $0x1], 1 }

</bundles_post_ra>
